<compile_context>
chip_gen: v7x
topology: tpu7x:2x2x1
jax: 0.10.0
libtpu: 0.0.40
codegen_flags: <defaults>
</compile_context>

<pallas_src>
import jax
import jax.numpy as jnp
from jax.experimental import pallas as pl
from jax.experimental.pallas import tpu as pltpu


def _bilinear_matrix(out_size: int, in_size: int) -> jnp.ndarray:
    """(out_size, in_size) bilinear interpolation matrix, half-pixel centers,
    align_corners=False (torchvision Resize bilinear semantics, no antialias)."""
    # TODO(synk): torchvision>=0.17 defaults antialias=True for tensor bilinear
    # downscale; this implements plain bilinear (no antialias filter).
    scale = in_size / out_size
    dst = jnp.arange(out_size, dtype=jnp.float32)
    src = jnp.clip((dst + 0.5) * scale - 0.5, 0.0, float(in_size - 1))
    lo = jnp.floor(src).astype(jnp.int32)
    hi = jnp.minimum(lo + 1, in_size - 1)
    frac = src - lo.astype(jnp.float32)
    w = (jax.nn.one_hot(lo, in_size, dtype=jnp.float32) * (1.0 - frac)[:, None]
         + jax.nn.one_hot(hi, in_size, dtype=jnp.float32) * frac[:, None])
    return w


def _resize_kernel(x_ref, rh_ref, rwt_ref, o_ref):
    """One grid step: one channel x one lane-aligned block of output columns.

    x_ref:   (1, Hin, Win)    input dtype (f32); cast to bf16 in-kernel
    rh_ref:  (Hout, Hin)      f32 height-interpolation matrix
    rwt_ref: (Win, wblk)      bf16 width-interpolation matrix block (Rw^T columns)
    o_ref:   (1, Hout, wblk)  output dtype -- resized image block (lane-dense)
    """
    xb = x_ref[0].astype(rwt_ref.dtype)                       # free VPU cast
    # Width contraction on the MXU: (Hin, Win) @ (Win, wblk), f32 accumulation.
    tmp = jnp.dot(xb, rwt_ref[...], preferred_element_type=jnp.float32)
    # Height contraction kept in f32 (no double rounding between the two matmuls).
    res = jnp.dot(rh_ref[...], tmp, preferred_element_type=jnp.float32)
    o_ref[0] = res.astype(o_ref.dtype)


def _pick_width_block(wout: int) -> int:
    """Largest lane-aligned (multiple-of-128) divisor of Wout up to 512; else
    the full width. Keeps MXU N-lanes full and output stores unmasked while
    giving the grid a second parallel axis when Wout is large."""
    for cand in (512, 384, 256, 128):
        if wout % cand == 0:
            return cand
    return wout


def _vmem_limit_bytes() -> int:
    """Generation-aware scoped-VMEM limit: headroom on 64 MiB v7x, large tiles
    allowed on 128 MiB v5e/v6e."""
    try:
        cap = pltpu.get_tpu_info().vmem_capacity_bytes
    except Exception:
        cap = 64 * 1024 * 1024  # conservative: v7x per-TensorCore VMEM
    return int(min(96 * 1024 * 1024, cap * 3 // 4))


def patchify_forward(x: jnp.ndarray, resize_shape, patch_size) -> jnp.ndarray:
    """Equivalent of Patchify.forward for a (C, H, W) input.

    The reference module calls .unfold(dim, size, step); only non-overlapping
    patches (size == step) are supported.
    """
    if isinstance(patch_size, int):
        p_size = p_step = patch_size
    else:
        p_size, p_step = patch_size
    assert p_size == p_step, "only non-overlapping patches supported (size == step)"
    p = p_size

    C, Hin, Win = x.shape
    Hout, Wout = resize_shape
    assert Hout >= p and Wout >= p, "patch size larger than the resized image"

    # Interpolation matrices (tiny parameter glue).
    rh = _bilinear_matrix(Hout, Hin)                                  # (Hout, Hin) f32
    rwt = _bilinear_matrix(Wout, Win).T.astype(jnp.bfloat16)          # (Win, Wout) bf16

    wblk = _pick_width_block(Wout)
    nwb = Wout // wblk

    flops = 2 * C * (Hin * Win * Wout + Hout * Hin * Wout)
    bytes_accessed = (C * Hin * Win * x.dtype.itemsize
                      + C * Hout * Wout * x.dtype.itemsize
                      + Hout * Hin * 4 + Win * Wout * 2)

    resized = pl.pallas_call(
        _resize_kernel,
        out_shape=jax.ShapeDtypeStruct((C, Hout, Wout), x.dtype),
        grid=(C, nwb),
        in_specs=[
            # x / rh block indices are constant along the inner (jw) axis -> no re-DMA.
            pl.BlockSpec((1, Hin, Win), lambda c, jw: (c, 0, 0)),
            pl.BlockSpec((Hout, Hin), lambda c, jw: (0, 0)),
            pl.BlockSpec((Win, wblk), lambda c, jw: (0, jw)),
        ],
        out_specs=pl.BlockSpec((1, Hout, wblk), lambda c, jw: (c, 0, jw)),
        compiler_params=pltpu.CompilerParams(
            dimension_semantics=("parallel", "parallel"),
            vmem_limit_bytes=_vmem_limit_bytes()),
        cost_estimate=pl.CostEstimate(
            flops=flops, transcendentals=0, bytes_accessed=bytes_accessed),
    )(x, rh, rwt)

    # Patch unfold on the small resized output (pure wrapper pass). Matches
    # torch .unfold(dim, p, p): floor(dim/p) windows, trailing remainder dropped.
    nh, nw = Hout // p, Wout // p
    patches = resized[:, :nh * p, :nw * p]
    return (patches.reshape(C, nh, p, nw, p)
                   .transpose(0, 1, 3, 2, 4)
                   .reshape(-1, p, p))


if __name__ == "__main__":
    key = jax.random.PRNGKey(0)
    C, H, W = 4, 32, 32
    resize_shape = (16, 16)
    patch = 8
    x = jax.random.normal(key, (C, H, W), dtype=jnp.float32)

    out = patchify_forward(x, resize_shape, (patch, patch))
    out = jax.block_until_ready(out)

    nh, nw = resize_shape[0] // patch, resize_shape[1] // patch
    assert out.shape == (C * nh * nw, patch, patch), out.shape

    # Plain-JAX f32 reference of the same math (kernel uses bf16 operands for
    # the width matmul with f32 accumulation, hence the loose tolerance).
    rh_f = _bilinear_matrix(resize_shape[0], H)
    rw_f = _bilinear_matrix(resize_shape[1], W)
    ref_resized = jnp.einsum('oh,chw,pw->cop', rh_f, x, rw_f)
    ref = (ref_resized.reshape(C, nh, patch, nw, patch)
                      .transpose(0, 1, 3, 2, 4)
                      .reshape(-1, patch, patch))
    err = float(jnp.max(jnp.abs(out.astype(jnp.float32) - ref)))
    assert jnp.allclose(out.astype(jnp.float32), ref, atol=5e-2, rtol=5e-2), err

    print("KERNEL_OK")
</pallas_src>

<mosaic_0001>
module attributes {stable_mosaic.version = 11 : i64} {
  func.func @_resize_kernel(%arg0: i32, %arg1: i32, %arg2: memref<1x32x32xf32, #tpu.memory_space<vmem>>, %arg3: memref<16x32xf32, #tpu.memory_space<vmem>>, %arg4: memref<32x16xbf16, #tpu.memory_space<vmem>>, %arg5: memref<1x16x16xf32, #tpu.memory_space<vmem>>) attributes {dimension_semantics = [#tpu.dimension_semantics<parallel>, #tpu.dimension_semantics<parallel>], iteration_bounds = array<i64: 4, 1>, scalar_prefetch = 0 : i64, scratch_operands = 0 : i64, tpu.core_type = #tpu.core_type<tc>, window_params = [{transform_indices = @transform_0, window_bounds = array<i64: 1, 32, 32>}, {pipeline_mode = #tpu.pipeline_mode<synchronous>, transform_indices = @transform_1, window_bounds = array<i64: 16, 32>}, {transform_indices = @transform_2, window_bounds = array<i64: 32, 16>}, {transform_indices = @transform_3, window_bounds = array<i64: 1, 16, 16>}]} {
    %c0 = arith.constant 0 : index
    %c0_0 = arith.constant 0 : index
    %c0_1 = arith.constant 0 : index
    %0 = vector.load %arg2[%c0, %c0_0, %c0_1] : memref<1x32x32xf32, #tpu.memory_space<vmem>>, vector<1x32x32xf32>
    %1 = vector.shape_cast %0 : vector<1x32x32xf32> to vector<32x32xf32>
    %2 = arith.truncf %1 : vector<32x32xf32> to vector<32x32xbf16>
    %c0_2 = arith.constant 0 : index
    %c0_3 = arith.constant 0 : index
    %3 = vector.load %arg4[%c0_2, %c0_3] : memref<32x16xbf16, #tpu.memory_space<vmem>>, vector<32x16xbf16>
    %cst = arith.constant dense<0.000000e+00> : vector<32x16xf32>
    %4 = tpu.matmul %2, %3, %cst {dimension_numbers = #tpu.dot_dimension_numbers<[1], [0], [0], [1], [0, 0, 1, 1], [], []>} : vector<32x32xbf16>, vector<32x16xbf16>, vector<32x16xf32> -> vector<32x16xf32>
    %c0_4 = arith.constant 0 : index
    %c0_5 = arith.constant 0 : index
    %5 = vector.load %arg3[%c0_4, %c0_5] : memref<16x32xf32, #tpu.memory_space<vmem>>, vector<16x32xf32>
    %cst_6 = arith.constant dense<0.000000e+00> : vector<16x16xf32>
    %6 = tpu.matmul %5, %4, %cst_6 {dimension_numbers = #tpu.dot_dimension_numbers<[1], [0], [0], [1], [0, 0, 1, 1], [], []>} : vector<16x32xf32>, vector<32x16xf32>, vector<16x16xf32> -> vector<16x16xf32>
    %c0_7 = arith.constant 0 : index
    %c0_8 = arith.constant 0 : index
    %c0_9 = arith.constant 0 : index
    %7 = vector.load %arg5[%c0_7, %c0_8, %c0_9] : memref<1x16x16xf32, #tpu.memory_space<vmem>>, vector<1x16x16xf32>
    %8 = vector.shape_cast %7 : vector<1x16x16xf32> to vector<16x16xf32>
    %9 = vector.shape_cast %6 : vector<16x16xf32> to vector<1x16x16xf32>
    tpu.vector_store %arg5[%c0_7, %c0_8, %c0_9], %9 {strides = array<i32>} : memref<1x16x16xf32, #tpu.memory_space<vmem>>, vector<1x16x16xf32>,
    return
  }
  func.func @transform_0(%arg0: i32, %arg1: i32) -> (i32, i32, i32) {
    %c0_i32 = arith.constant 0 : i32
    %c0_i32_0 = arith.constant 0 : i32
    %c0_i32_1 = arith.constant 0 : i32
    return %arg0, %c0_i32, %c0_i32_0 : i32, i32, i32
  }
  func.func @transform_1(%arg0: i32, %arg1: i32) -> (i32, i32) {
    %c0_i32 = arith.constant 0 : i32
    %c0_i32_0 = arith.constant 0 : i32
    %c0_i32_1 = arith.constant 0 : i32
    return %c0_i32, %c0_i32_0 : i32, i32
  }
  func.func @transform_2(%arg0: i32, %arg1: i32) -> (i32, i32) {
    %c0_i32 = arith.constant 0 : i32
    %c0_i32_0 = arith.constant 0 : i32
    return %c0_i32, %arg1 : i32, i32
  }
  func.func @transform_3(%arg0: i32, %arg1: i32) -> (i32, i32, i32) {
    %c0_i32 = arith.constant 0 : i32
    %c0_i32_0 = arith.constant 0 : i32
    return %arg0, %c0_i32, %arg1 : i32, i32, i32
  }
}

</mosaic_0001>

<bundles_post_ra>
// kernel: tpu_custom_call.1
= control target key start
LH: loop header
LB: loop body
LE: loop exit
PB: predicated region body
PF: predicated region fallthrough
CT: control target
= control target key end

     0   :  { %8 = vsyncpa [#allocation3], 0  ;;  %s957_s0 = inlined_call_operand.hbm [shape: f32[4,32,32], index: 0, kind: input, shape index: {}]   ;;  %s958_s1 = inlined_call_operand.vmem [shape: f32[16,32], index: 1, kind: input, shape index: {}]   ;;  %s959_s2 = inlined_call_operand.vmem [shape: bf16[32,16], index: 2, kind: input, shape index: {}]   ;;  %s960_s3 = inlined_call_operand.hbm [shape: f32[4,16,16], index: 3, kind: output, shape index: {}]  }
   0x1   :  { %10 = vsyncpa [#allocation3 + $0x1], 0 }
   0x2   :  { %11 = vsyncpa [#allocation4], 0 }
   0x3   :  { %13 = vsyncpa [#allocation4 + $0x1], 0  ;;  %s767_s12 = smov 0   ;;  %s769_s13 = smov 0  }
   0x4   :  { %s771_s14 = smov 0   ;;  %s773_s15 = smov 0  }
   0x5   :  { %s775_s16 = smov 0   ;;  %s777_s17 = smov 0  }
   0x6 LB: > { %s498_s18 = sadd.s32 4294967295, %s739_s17   ;;  %s499_s19 = sadd.s32 4294967294, %s739_s17   ;;  %s739_s17 = sphi %s777_s17, %s19_s17   ;;  %s735_s16 = sphi %s775_s16, %s974_s16   ;;  %s731_s15 = sphi %s773_s15, %s973_s15   ;;  %s727_s14 = sphi %s771_s14, %s972_s14   ;;  %s723_s13 = sphi %s769_s13, %s971_s13   ;;  %s719_s12 = sphi %s767_s12, %s970_s12  }
   0x7   : > { %s31_s20 = sadd.s32 1, %s735_s16  ;;  %s38_s21 = sadd.s32 1, %s727_s14 }
   0x8   : > { %p33_p0 = scmp.ge.s32.totalorder %s31_s20, 4  ;;  %p45_p1 = scmp.ne.s32.totalorder %s727_s14, %s723_s13 }
   0x9   : > { %p46_p2 = scmp.eq.s32.totalorder %s739_s17, 0  ;;  %p51_p3 = scmp.ne.s32.totalorder %s723_s13, %s719_s12 }
   0xa   : > { %s976_s20 = smov (%p33_p0, %s31_s20), 0  ;;  %p52_p5 = scmp.eq.s32.totalorder %s498_s18, 0 }
   0xb   : > { %p808_p4 = por %p46_p2, %p45_p1  ;;  %s35_s23 = ssub.s32 %s735_s16, %s976_s20 }
   0xc   : > { %p124_p6 = scmp.eq.s32.totalorder %s498_s18, 3  ;;  %p36_p7 = scmp.eq.s32.totalorder %s35_s23, 0 }
   0xd   : > { %p814_p8 = por %p52_p5, %p51_p3  ;;  %p130_p10 = scmp.eq.s32.totalorder %s499_s19, 3 }
   0xe   : > { %p818_p9 = por %p124_p6, %p45_p1  ;;  %p571_p12 = scmp.lt.s32.totalorder %s739_s17, 4 }
   0xf   : > { %s823_s26 = scalar_select %p36_p7, %s727_s14, %s38_s21  }
  0x10   : > { %s964_s25 = scalar_select %p818_p9, 1, 0 }
  0x11   : > { %p825_p11 = por %p130_p10, %p51_p3  ;;  %s160_s28 = sand.u32 1, %s727_s14  }
  0x12   : > { %s503_s29 = sshll.u32 %s160_s28, 5  ;;  %s520_s30 = sshll.u32 %s735_s16, 9 }
  0x13   : > { %s965_s27 = scalar_select %p825_p11, 1, 0 }
  0x14   : > { %s835_s6 = scalar_lea.hbm %s957_s0, %s520_s30  ;;  %s164_s7 = scalar_lea.vmem [#allocation2], %s503_s29 }
  0x15   : > { %s171_s8 = sshll.u32 %s164_s7, 4  ;;  %p841_p13 = pnand %p571_p12, %p808_p4  ;;  %s837_s8 = int_to_ptr.vmem [resolvable:$true] %s171_s8 }
  0x16   : > { %s846_s10 = scalar_lea.sflag [#allocation3], %s160_s28  ;;  %s627_s11 = scalar_lea.hbm %s835_s6, 512 }
  0x17   : > { %p628_p1 = scmp.ne.s32.totalorder %s835_s6, %s627_s11  ;;  %p629_p2 = pneg %p841_p13 }
  0x18   : > { %s632_s21 = scalar_lea.hbm %s957_s0, 2048  ;;  %p633_p4 = scmp.lt.u32.totalorder %s835_s6, %s957_s0 }
  0x19   : > { %p630_p3 = pnand %p629_p2, %p628_p1  ;;  %p634_p6 = scmp.lt.u32.totalorder %s632_s21, %s627_s11 }
  0x1a   : > { %p636_p10 = scmp.lt.u32.totalorder %s627_s11, %s835_s6 }
  0x1b   : > { %p631_p5 = pneg %p630_p3  ;;  %p635_p7 = por %p634_p6, %p633_p4 }
  0x1d   : > { %p637_p12 = por %p636_p10, %p635_p7 }
  0x1f   : > { %p638_p0 = pnand %p637_p12, %p631_p5 }
  0x21   : > { %641 = shalt.err (!%p638_p0)
}
  0x22   : > { %s642_s28 = scalar_lea.vmem %s837_s8, 512  ;;  %s741_s29 = smov [#allocation2]  }
  0x23   : > { %p643_p1 = scmp.ne.s32.totalorder %s837_s8, %s642_s28  ;;  %s647_s30 = sshll.u32 %s741_s29, 4  ;;  %s648_s30 = int_to_ptr.vmem [resolvable:$false] %s647_s30 }
  0x24   : > { %s649_s4 = scalar_lea.vmem %s648_s30, 1024  ;;  %p650_p9 = scmp.lt.s32.totalorder %s837_s8, %s648_s30 }
  0x25   : > { %p645_p3 = pnand %p643_p1, %p629_p2  ;;  %p651_p4 = scmp.lt.s32.totalorder %s649_s4, %s642_s28 }
  0x27   : > { %p646_p11 = pneg %p645_p3  ;;  %p652_p6 = por %p651_p4, %p650_p9 }
  0x29   : > { %p653_p7 = pnand %p652_p6, %p646_p11 }
  0x2b   : > { %656 = shalt.err (!%p653_p7)
}
  0x2c   : > { %s742_s5 = smov 128   ;;  %s743_s7 = smov 8  }
  0x2d   : > { %566 = dma.hbm_to_vmem [thread:$0]  (!%p841_p13), %s835_s6, 512, %s837_s8, %s846_s10, %s742_s5, %s742_s5, %s743_s7  }
  0x2e   : > { %p179_p0 = scmp.lt.s32.totalorder %s739_s17, 5  ;;  %p967_p2 = scmp.ge.s32.totalorder %s739_s17, 1 }
  0x30   : > { %p180_p5 = pnand %p967_p2, %p179_p0 }
  0x31   : > { %s878_s11 = sand.u32 (!%p180_p5), 1, %s723_s13  }
  0x32   : > { %183 = sbr.rel (%p180_p5) target bundleno = 520 (0x208), region = 32  ;;  %s507_s18 = sshll.u32 (!%p180_p5), %s878_s11, 5 }
  0x33   : > { %s186_s19 = scalar_lea.sflag (!%p180_p5), [#allocation3], %s878_s11  ;;  %s189_s21 = scalar_lea.vmem (!%p180_p5), [#allocation2], %s507_s18 }
  0x39   : > { %710 = dma.done.wait (%p814_p8), %s186_s19, 512  }
  0x3a   : > { %712 = vsyncadd (%p814_p8), %s186_s19, 4294966784  ;;  %v625_v0 = vld [vmem:[%s959_s2] sm:$0xff]   ;;  %v626_v1 = vld [vmem:[%s959_s2 + $0x8] sm:$0xff]   ;;  %vm243_vm0 = vcmask 261120   ;;  %s508_s29 = sshll.u32 %s878_s11, 4  ;;  %s521_s5 = sshll.u32 %s731_s15, 8 }
  0x3b   : > { %532 = vmatprep.subr.bf16.mxu0 %v625_v0  ;;  %v221_v2 = vld [vmem:[%s189_s21] sm:$0xff]  ;;  %v222_v3 = vld [vmem:[%s189_s21 + $0x8] sm:$0xff]  ;;  %v223_v5 = vld [vmem:[%s189_s21 + $0x10] sm:$0xff]  ;;  %s215_s30 = scalar_lea.vmem [#allocation5], %s508_s29  ;;  %vm382_vm1 = vcmask 130048   ;;  %s909_s19 = scalar_lea.hbm %s960_s3, %s521_s5 }
  0x3c   : > { %533 = vmatpush3.bf16.msra.mxu0 %v625_v0  ;;  %v225_v4 = vpack.c.bf16 %v222_v3, %v221_v2  ;;  %v224_v6 = vld [vmem:[%s189_s21 + $0x18] sm:$0xff]  ;;  %v299_v8 = vld [vmem:[%s958_s1] sm:$0xff]  ;;  %v300_v15 = vld [vmem:[%s958_s1 + $0x8] sm:$0xff]  ;;  %s400_s4 = sshll.u32 %s215_s30, 4  ;;  %s386_s21 = scalar_lea.sflag [#allocation4], %s878_s11  ;;  %s904_s4 = int_to_ptr.vmem [resolvable:$true] %s400_s4 }
  0x3d   : > { %534 = vmatprep.subr.bf16.mxu0 %v626_v1  ;;  %v226_v7 = vpack.c.bf16 %v224_v6, %v223_v5  ;;  %548 = vmatprep.mubr.msk.f32.mxu1 %vm243_vm0, %v299_v8  ;;  %s657_s9 = scalar_lea.vmem %s904_s4, 256  ;;  %p968_p9 = scmp.ne.s32.totalorder %s964_s25, 0 }
  0x3e   : > { %536 = vmatprep.mubr.msk.bf16.mxu0 %vm243_vm0, %v225_v4  ;;  %p658_p8 = scmp.ne.s32.totalorder %s904_s4, %s657_s9  ;;  %s744_s15 = smov [#allocation5]  }
  0x3f   : > { %s661_s6 = sshll.u32 %s744_s15, 4  ;;  %s662_s6 = int_to_ptr.vmem [resolvable:$false] %s661_s6 }
  0x40   : > { %535 = vmatpush3.bf16.msra.mxu0 %v626_v1  ;;  %p659_p11 = pnand %p658_p8, %p968_p9  ;;  %s663_s8 = scalar_lea.vmem %s662_s6, 512 }
  0x41   : > { %p664_p10 = scmp.lt.s32.totalorder %s904_s4, %s662_s6  ;;  %p665_p12 = scmp.lt.s32.totalorder %s663_s8, %s657_s9 }
  0x42   : > { %p660_p13 = pneg %p659_p11 }
  0x43   : > { %537 = vmatmul.mubr.msk.bf16.vlgmr.msra.gmra.mrb[0].mxu0 %vm243_vm0, %v226_v7  ;;  %p666_p1 = por %p665_p12, %p664_p10 }
  0x45   : > { %p667_p3 = pnand %p666_p1, %p660_p13 }
 0x116   : > { %v538_v9 = vpop.f32.mrb[0].mxu0 }
 0x117   : > { %v284_v10 = vpop.f32.mrb[1].mxu0 }
 0x118   : > { %v539_v11 = vpop.f32.mrb[2].mxu0 }
 0x119   : > { %v555_v12 = vpack.c.bf16 %v539_v11, %v538_v9  ;;  %v287_v13 = vpop.f32.mrb[3].mxu0 }
 0x11a   : > { %v551_v14 = vpack.c.bf16 %v287_v13, %v284_v10 }
 0x11c   : > { %552 = vmatprep.subr.bf16.mxu1 %v551_v14 }
 0x11d   : > { %554 = vmatpush3.bf16.msra.mxu1 %v551_v14 }
 0x11e   : > { %556 = vmatprep.subr.bf16.mxu1 %v555_v12 }
 0x121   : > { %558 = vmatpush3.bf16.msra.mxu1 %v555_v12 }
 0x124   : > { %549 = vmatmul.mubr.msk.f32.vlgmr.msra.gmra.mrb[0].mxu1 %vm243_vm0, %v300_v15 }
 0x1f7   : > { %v550_v16 = vpop.f32.mrb[0].mxu1 }
 0x1f8   : > { %384 = vst.msk [vmem:[%s215_s30 + $0x8] sm:$0xff] %vm382_vm1, %v550_v16  ;;  %v373_v17 = vpop.f32.mrb[1].mxu1 }
 0x1f9   : > { %383 = vst.msk [vmem:[%s215_s30] sm:$0xff] %vm382_vm1, %v373_v17 }
 0x1fa   : > { %670 = shalt.err (!%p667_p3)
}
 0x1fb   : > { %s671_s10 = scalar_lea.hbm %s909_s19, 256  ;;  %s675_s23 = scalar_lea.hbm %s960_s3, 1024 }
 0x1fc   : > { %p672_p4 = scmp.ne.s32.totalorder %s909_s19, %s671_s10  ;;  %p676_p0 = scmp.lt.u32.totalorder %s909_s19, %s960_s3 }
 0x1fd   : > { %p677_p2 = scmp.lt.u32.totalorder %s675_s23, %s671_s10  ;;  %p679_p8 = scmp.lt.u32.totalorder %s671_s10, %s909_s19 }
 0x1fe   : > { %p673_p6 = pnand %p672_p4, %p968_p9 }
 0x1ff   : > { %p678_p5 = por %p677_p2, %p676_p0 }
 0x200   : > { %p674_p7 = pneg %p673_p6 }
 0x201   : > { %p680_p11 = por %p679_p8, %p678_p5 }
 0x203   : > { %p681_p13 = pnand %p680_p11, %p674_p7 }
 0x205   : > { %684 = shalt.err (!%p681_p13)
}
 0x206   : > { %s745_s30 = smov 128   ;;  %s746_s5 = smov 8  }
 0x207   : > { %561 = dma.vmem_to_hbm [thread:$0]  (%p968_p9), %s904_s4, 256, %s909_s19, %s386_s21, %s745_s30, %s745_s30, %s746_s5  }
 0x208 PF: > { %p572_p10 = scmp.ge.s32.totalorder %s739_s17, 2  ;;  %s415_s7 = sand.u32 1, %s719_s12  }
 0x209   : > { %p969_p12 = scmp.ne.s32.totalorder %s965_s27, 0  ;;  %s416_s18 = scalar_lea.sflag [#allocation4], %s415_s7 }
 0x20b   : > { %p568_p1 = pnand %p572_p10, %p969_p12 }
 0x20d   : > { %714 = dma.done.wait (!%p568_p1), %s416_s18, 256  }
 0x20e   : > { %716 = vsyncadd (!%p568_p1), %s416_s18, 4294967040  ;;  %s19_s17 = sadd.s32 1, %s739_s17   ;;  %s970_s12 = smov %s723_s13 }
 0x20f   : > { %p16_p3 = scmp.ge.s32.totalorder %s19_s17, 6   ;;  %s971_s13 = smov %s727_s14 }
 0x210   : > { %s972_s14 = smov %s823_s26  ;;  %s973_s15 = smov %s735_s16 }
 0x211   : > { %s974_s16 = smov %s976_s20  ;;  %18 = sbr.rel (!%p16_p3) target bundleno = 6 (0x6), region = 80 }
 0x218   :  { %421 = vsyncpa [#allocation3], 1 }
 0x219   :  { %423 = vsyncpa [#allocation3 + $0x1], 1 }
 0x21a   :  { %424 = vsyncpa [#allocation4], 1 }
 0x21b   :  { %426 = vsyncpa [#allocation4 + $0x1], 1 }

</bundles_post_ra>
